<compile_context>
chip_gen: v7x
topology: tpu7x:2x2x1
jax: 0.10.0
libtpu: 0.0.40
codegen_flags: <defaults>
</compile_context>

<pallas_src>
from dataclasses import dataclass, field
from typing import Any

import numpy as np

import jax
import jax.numpy as jnp
from jax.experimental import pallas as pl
from jax.experimental.pallas import tpu as pltpu


# ----------------------------------------------------------------------------
# Minimal SparseTensor container (mirrors the fields the module touches).
# ----------------------------------------------------------------------------
@dataclass
class SparseTensor:
    F: jnp.ndarray                 # (N, C) features
    C: jnp.ndarray                 # (N, D+1) integer coordinates
    s: int                         # current stride
    coord_maps: Any = field(default=None)
    kernel_maps: Any = field(default=None)


# ----------------------------------------------------------------------------
# Pallas kernel: elementwise ReLU over a lane-dense (block_rows, 1024) block.
# ----------------------------------------------------------------------------
def _relu_kernel(f_ref, o_ref):
    # Scalar zero constant -> folds into the VPU max (no broadcast operand).
    o_ref[...] = jnp.maximum(f_ref[...], jnp.zeros((), f_ref.dtype))


_LANE = 1024                       # lane-dense last dim (8 x 128 lanes)
_TARGET_BLOCK_BYTES = 2 << 20      # ~2 MiB per block buffer


def _cdiv(a: int, b: int) -> int:
    return -(-a // b)


def _round_up(a: int, b: int) -> int:
    return _cdiv(a, b) * b


def _choose_tiling(total_elems: int, itemsize: int):
    """Pick (block_rows, padded_rows) for a (rows, _LANE) slab."""
    # Sublane-packing minimum: f32 -> 8 rows, bf16 -> 16, int8/fp8 -> 32.
    min_rows = max(8, 32 // itemsize)
    rows = max(1, _cdiv(total_elems, _LANE))
    target_rows = max(min_rows, _TARGET_BLOCK_BYTES // (_LANE * itemsize))
    target_rows = (target_rows // min_rows) * min_rows
    block_rows = min(target_rows, _round_up(rows, min_rows))
    # Give multi-TensorCore chips (v7x) at least 2 grid blocks when there is
    # enough data to split.
    if rows > 2 * min_rows and _round_up(rows, block_rows) // block_rows < 2:
        block_rows = max(min_rows, _round_up(_cdiv(rows, 2), min_rows))
    padded_rows = _round_up(rows, block_rows)
    return block_rows, padded_rows


@jax.jit
def minkowski_activation_features(features: jnp.ndarray) -> jnp.ndarray:
    """Apply the activation to (N, C) features with a Pallas TPU kernel."""
    orig_shape = features.shape
    dtype = features.dtype
    total = int(np.prod(orig_shape))
    itemsize = jnp.dtype(dtype).itemsize

    block_rows, padded_rows = _choose_tiling(total, itemsize)
    padded_total = padded_rows * _LANE

    flat = features.reshape(-1)
    if padded_total != total:
        flat = jnp.pad(flat, (0, padded_total - total))
    slab = flat.reshape(padded_rows, _LANE)

    grid = (padded_rows // block_rows,)
    out = pl.pallas_call(
        _relu_kernel,
        out_shape=jax.ShapeDtypeStruct((padded_rows, _LANE), dtype),
        grid_spec=pltpu.PrefetchScalarGridSpec(
            num_scalar_prefetch=0,
            grid=grid,
            in_specs=[pl.BlockSpec((block_rows, _LANE), lambda i: (i, 0))],
            out_specs=pl.BlockSpec((block_rows, _LANE), lambda i: (i, 0)),
        ),
        compiler_params=pltpu.CompilerParams(
            dimension_semantics=("parallel",),
        ),
        input_output_aliases={0: 0},   # inplace=True semantics
    )(slab)

    return out.reshape(-1)[:total].reshape(orig_shape)


# ----------------------------------------------------------------------------
# Module-equivalent wrapper: reproduces MinkowskiActivation.forward exactly.
# ----------------------------------------------------------------------------
class MinkowskiActivation:
    def __init__(self, inplace: bool = True):
        # Parameter-free module (no weights to initialize).
        pass

    def __call__(self, inputs: SparseTensor) -> SparseTensor:
        features = inputs.F
        coords = inputs.C
        cur_stride = inputs.s
        output_features = minkowski_activation_features(features)
        output_tensor = SparseTensor(output_features, coords, cur_stride)
        output_tensor.coord_maps = inputs.coord_maps
        output_tensor.kernel_maps = inputs.kernel_maps
        return output_tensor


if __name__ == "__main__":
    key = jax.random.PRNGKey(0)
    k_feat, k_coord = jax.random.split(key)

    # Small sparse-tensor example: N=250 active points (deliberately NOT a
    # tile multiple, to exercise the padding path), C=32 feature channels,
    # coordinates are (batch, x, y, z) int32.
    N, C_CH = 250, 32
    features = jax.random.normal(k_feat, (N, C_CH), dtype=jnp.float32)
    coords = jax.random.randint(k_coord, (N, 4), minval=0, maxval=16,
                                dtype=jnp.int32)

    inputs = SparseTensor(F=features, C=coords, s=1,
                          coord_maps={}, kernel_maps={})

    module = MinkowskiActivation()
    out = module(inputs)
    jax.block_until_ready(out.F)

    # Correctness check against plain-JAX reference.
    ref = jnp.maximum(features, 0.0)
    assert out.F.shape == features.shape and out.F.dtype == features.dtype
    assert jnp.allclose(out.F, ref), "activation mismatch vs reference"
    assert out.C is coords and out.s == 1
    assert out.coord_maps is inputs.coord_maps
    assert out.kernel_maps is inputs.kernel_maps

    print("KERNEL_OK")
</pallas_src>

<mosaic_0001>
module attributes {stable_mosaic.version = 11 : i64} {
  func.func @_relu_kernel(%arg0: i32, %arg1: memref<8x1024xf32, #tpu.memory_space<vmem>>, %arg2: memref<8x1024xf32, #tpu.memory_space<vmem>>) attributes {dimension_semantics = [#tpu.dimension_semantics<parallel>], iteration_bounds = array<i64: 1>, scalar_prefetch = 0 : i64, scratch_operands = 0 : i64, tpu.core_type = #tpu.core_type<tc>, window_params = [{transform_indices = @transform_0, window_bounds = array<i64: 8, 1024>}, {transform_indices = @transform_1, window_bounds = array<i64: 8, 1024>}]} {
    %c0 = arith.constant 0 : index
    %c0_0 = arith.constant 0 : index
    %0 = vector.load %arg1[%c0, %c0_0] : memref<8x1024xf32, #tpu.memory_space<vmem>>, vector<8x1024xf32>
    %cst = arith.constant 0.000000e+00 : f32
    %1 = vector.broadcast %cst : f32 to vector<8x1024xf32>
    %2 = arith.maximumf %0, %1 : vector<8x1024xf32>
    %c0_1 = arith.constant 0 : index
    %c0_2 = arith.constant 0 : index
    %3 = vector.load %arg2[%c0_1, %c0_2] : memref<8x1024xf32, #tpu.memory_space<vmem>>, vector<8x1024xf32>
    tpu.vector_store %arg2[%c0_1, %c0_2], %2 {strides = array<i32>} : memref<8x1024xf32, #tpu.memory_space<vmem>>, vector<8x1024xf32>,
    return
  }
  func.func @transform_0(%arg0: i32) -> (i32, i32) {
    %c0_i32 = arith.constant 0 : i32
    %c0_i32_0 = arith.constant 0 : i32
    return %arg0, %c0_i32 : i32, i32
  }
  func.func @transform_1(%arg0: i32) -> (i32, i32) {
    %c0_i32 = arith.constant 0 : i32
    %c0_i32_0 = arith.constant 0 : i32
    return %arg0, %c0_i32 : i32, i32
  }
}

</mosaic_0001>

<bundles_post_ra>
// kernel: minkowski_activation_features.1
= control target key start
LH: loop header
LB: loop body
LE: loop exit
PB: predicated region body
PF: predicated region fallthrough
CT: control target
= control target key end

     0   :  { %s94_s0 = inlined_call_operand.vmem [shape: f32[8,1024], index: 0, kind: input, shape index: {}, may-alias: {0,1}]   ;;  %s95_s1 = inlined_call_operand.vmem [shape: f32[8,1024], index: 1, kind: output, shape index: {}, may-alias: {0,1}]  }
   0x1   :  { %v8_v0 = vld [vmem:[%s94_s0] sm:$0xff]  ;;  %v9_v1 = vld [vmem:[%s94_s0 + $0x8] sm:$0xff]  ;;  %v10_v2 = vld [vmem:[%s94_s0 + $0x10] sm:$0xff] }
   0x2   :  { %v16_v3 = vmax.f32 %v8_v0, 0.0  ;;  %v17_v4 = vmax.f32 %v9_v1, 0.0  ;;  %v18_v5 = vmax.f32 %v10_v2, 0.0  ;;  %v11_v6 = vld [vmem:[%s94_s0 + $0x18] sm:$0xff]  ;;  %v12_v7 = vld [vmem:[%s94_s0 + $0x20] sm:$0xff]  ;;  %v13_v8 = vld [vmem:[%s94_s0 + $0x28] sm:$0xff] }
   0x3   :  { %v19_v9 = vmax.f32 %v11_v6, 0.0  ;;  %v20_v10 = vmax.f32 %v12_v7, 0.0  ;;  %v21_v11 = vmax.f32 %v13_v8, 0.0  ;;  %v14_v12 = vld [vmem:[%s94_s0 + $0x30] sm:$0xff]  ;;  %v15_v13 = vld [vmem:[%s94_s0 + $0x38] sm:$0xff] }
   0x4   :  { %24 = vst [vmem:[%s95_s1] sm:$0xff] %v16_v3  ;;  %25 = vst [vmem:[%s95_s1 + $0x8] sm:$0xff] %v17_v4  ;;  %v22_v14 = vmax.f32 %v14_v12, 0.0  ;;  %v23_v15 = vmax.f32 %v15_v13, 0.0 }
   0x5   :  { %26 = vst [vmem:[%s95_s1 + $0x10] sm:$0xff] %v18_v5  ;;  %27 = vst [vmem:[%s95_s1 + $0x18] sm:$0xff] %v19_v9 }
   0x6   :  { %28 = vst [vmem:[%s95_s1 + $0x20] sm:$0xff] %v20_v10  ;;  %29 = vst [vmem:[%s95_s1 + $0x28] sm:$0xff] %v21_v11 }
   0x7   :  { %30 = vst [vmem:[%s95_s1 + $0x30] sm:$0xff] %v22_v14  ;;  %31 = vst [vmem:[%s95_s1 + $0x38] sm:$0xff] %v23_v15 }

</bundles_post_ra>
